<compile_context>
chip_gen: v5e
topology: v5e:2x2
jax: 0.10.0
libtpu: 0.0.40
codegen_flags: <defaults>
</compile_context>

<pallas_src>
from functools import partial

import jax
import jax.numpy as jnp
from jax.experimental import pallas as pl
from jax.experimental.pallas import tpu as pltpu


TOKENS_PER_BLOCK = 256  # rows gathered per grid step -> (256, 128) f32 output tile


# ------------------------------ Pallas kernel --------------------------------

def _embedding_gather_kernel(ids_ref, table_ref, out_ref, *, tokens_per_block):
    """Gather `tokens_per_block` embedding rows via a one-hot MXU matmul.

    ids_ref:   VMEM (1, T) int32   -- token ids for this grid step.
    table_ref: VMEM (V, E)         -- full embedding table (resident; constant block).
    out_ref:   VMEM (T, E)         -- lane-dense output tile for this grid step.
    """
    V = table_ref.shape[0]
    ids = ids_ref[0, :]                              # (T,)
    ids = jnp.clip(ids, 0, V - 1)                    # guard against OOB VMEM reads

    # One-hot gather on the MXU: (T, V) @ (V, E) -> (T, E), single unmasked store.
    iota_v = jax.lax.broadcasted_iota(jnp.int32, (tokens_per_block, V), 1)
    one_hot = (ids[:, None] == iota_v).astype(table_ref.dtype)
    out_ref[...] = jnp.dot(
        one_hot, table_ref[...], preferred_element_type=jnp.float32
    ).astype(out_ref.dtype)


# ------------------------------ host wrappers ---------------------------------

def embedding_lookup(indices, table):
    """indices: int array, any shape; table: (V, E) -> (*indices.shape, E)."""
    V, E = table.shape
    flat = indices.reshape(-1).astype(jnp.int32)
    n = flat.shape[0]
    n_blocks = max(pl.cdiv(n, TOKENS_PER_BLOCK), 1)
    n_pad = n_blocks * TOKENS_PER_BLOCK
    if n_pad != n:
        flat = jnp.concatenate([flat, jnp.zeros((n_pad - n,), jnp.int32)])
    ids2d = flat.reshape(n_blocks, TOKENS_PER_BLOCK)

    # VMEM budget: double-buffered table + pipelined out tiles + ids + headroom.
    itemsize = jnp.dtype(table.dtype).itemsize
    table_bytes = V * E * itemsize
    out_tile_bytes = TOKENS_PER_BLOCK * E * itemsize
    vmem_limit = int(min(2 * table_bytes + 4 * out_tile_bytes + (8 << 20), 60 << 20))

    # Megacore sharding only pays off when there is more than one block of tokens
    # (otherwise it just duplicates the table fetch on v7x's second TensorCore).
    dim_sem = ("parallel",) if n_blocks >= 2 else ("arbitrary",)

    out = pl.pallas_call(
        partial(_embedding_gather_kernel, tokens_per_block=TOKENS_PER_BLOCK),
        out_shape=jax.ShapeDtypeStruct((n_pad, E), table.dtype),
        grid_spec=pltpu.PrefetchScalarGridSpec(
            num_scalar_prefetch=0,
            grid=(n_blocks,),
            in_specs=[
                # Per-step id slice, pipelined by BlockSpec (no SMEM size ceiling).
                pl.BlockSpec((1, TOKENS_PER_BLOCK), lambda i: (i, 0)),
                # Whole 2D table VMEM-resident; constant block index -> DMA'd once.
                pl.BlockSpec((V, E), lambda i: (0, 0)),
            ],
            out_specs=pl.BlockSpec((TOKENS_PER_BLOCK, E), lambda i: (i, 0)),
        ),
        compiler_params=pltpu.CompilerParams(
            dimension_semantics=dim_sem,
            vmem_limit_bytes=vmem_limit,
        ),
    )(ids2d, table)

    return out[:n].reshape(*indices.shape, E)


def embedding_layer_forward(params, token_tag, type="vocab"):
    """Mirrors EmbeddingLayer.forward(token_tag, type)."""
    if type == "vocab":
        table = params["tok_embedding"]
    elif type == "tag":
        table = params["tag_embedding"]
    else:
        raise ValueError(f"unknown type: {type!r}")
    return embedding_lookup(token_tag, table)


def init_params(key, cfg):
    k_tok, k_tag = jax.random.split(key)
    tok = jax.random.normal(k_tok, (cfg["vocab_size"], cfg["embedding_dim"]), jnp.float32)
    tag = jax.random.normal(k_tag, (cfg["tag_size"], cfg["embedding_dim"]), jnp.float32)
    # nn.Embedding(padding_idx=0) zeroes row 0 at init -> forward returns zeros for id 0.
    # NOTE: trained tables must keep row 0 zeroed externally if this property is relied on.
    tok = tok.at[0].set(0.0)
    tag = tag.at[0].set(0.0)
    return {"tok_embedding": tok, "tag_embedding": tag}


# ----------------------------------- main --------------------------------------

if __name__ == "__main__":
    # embedding_dim = 128 keeps every kernel store lane-dense.
    cfg = dict(vocab_size=32, tag_size=16, embedding_dim=128)
    B, S = 2, 8

    key = jax.random.PRNGKey(0)
    k_par, k_tok, k_tag = jax.random.split(key, 3)
    params = init_params(k_par, cfg)

    token_ids = jax.random.randint(k_tok, (B, S), 0, cfg["vocab_size"], dtype=jnp.int32)
    tag_ids = jax.random.randint(k_tag, (B, S), 0, cfg["tag_size"], dtype=jnp.int32)

    tok_emb = embedding_layer_forward(params, token_ids, type="vocab")
    tag_emb = embedding_layer_forward(params, tag_ids, type="tag")
    tok_emb, tag_emb = jax.block_until_ready((tok_emb, tag_emb))

    assert tok_emb.shape == (B, S, cfg["embedding_dim"]), tok_emb.shape
    assert tag_emb.shape == (B, S, cfg["embedding_dim"]), tag_emb.shape

    # Exact-match check against a pure-JAX reference gather.
    ref_tok = params["tok_embedding"][token_ids]
    ref_tag = params["tag_embedding"][tag_ids]
    assert bool(jnp.all(tok_emb == ref_tok))
    assert bool(jnp.all(tag_emb == ref_tag))

    # padding_idx=0 rows come back as zeros.
    pad_emb = embedding_layer_forward(params, jnp.zeros((1, 4), jnp.int32), type="vocab")
    assert bool(jnp.all(pad_emb == 0.0))
    assert bool(jnp.all(jnp.isfinite(tok_emb))) and bool(jnp.all(jnp.isfinite(tag_emb)))

    # Multi-block path (grid > 1, "parallel" semantics) also matches the reference.
    big_ids = jax.random.randint(key, (3, 200), 0, cfg["vocab_size"], dtype=jnp.int32)
    big_emb = jax.block_until_ready(embedding_layer_forward(params, big_ids, type="vocab"))
    assert bool(jnp.all(big_emb == params["tok_embedding"][big_ids]))

    print("KERNEL_OK")
</pallas_src>

<mosaic_0001>
module attributes {stable_mosaic.version = 11 : i64} {
  func.func @_embedding_gather_kernel(%arg0: i32, %arg1: memref<1x256xi32, #tpu.memory_space<vmem>>, %arg2: memref<32x128xf32, #tpu.memory_space<vmem>>, %arg3: memref<256x128xf32, #tpu.memory_space<vmem>>) attributes {dimension_semantics = [#tpu.dimension_semantics<arbitrary>], iteration_bounds = array<i64: 1>, scalar_prefetch = 0 : i64, scratch_operands = 0 : i64, tpu.core_type = #tpu.core_type<tc>, window_params = [{transform_indices = @transform_0, window_bounds = array<i64: 1, 256>}, {pipeline_mode = #tpu.pipeline_mode<synchronous>, transform_indices = @transform_1, window_bounds = array<i64: 32, 128>}, {transform_indices = @transform_2, window_bounds = array<i64: 256, 128>}]} {
    %c0 = arith.constant 0 : index
    %c0_0 = arith.constant 0 : index
    %0 = vector.load %arg1[%c0, %c0_0] : memref<1x256xi32, #tpu.memory_space<vmem>>, vector<1x256xi32>
    %1 = vector.shape_cast %0 : vector<1x256xi32> to vector<256xi32>
    %c0_i32 = arith.constant 0 : i32
    %c31_i32 = arith.constant 31 : i32
    %2 = vector.broadcast %c0_i32 : i32 to vector<256xi32>
    %3 = arith.maxsi %2, %1 : vector<256xi32>
    %4 = vector.broadcast %c31_i32 : i32 to vector<256xi32>
    %5 = arith.minsi %4, %3 : vector<256xi32>
    %6 = tpu.iota {dimensions = array<i32: 1>} : vector<256x32xi32>
    %7 = vector.shape_cast %5 : vector<256xi32> to vector<256x1xi32>
    %8 = vector.broadcast %7 : vector<256x1xi32> to vector<256x32xi32>
    %9 = arith.cmpi eq, %8, %6 : vector<256x32xi32>
    %10 = arith.extui %9 : vector<256x32xi1> to vector<256x32xi32>
    %11 = arith.sitofp %10 : vector<256x32xi32> to vector<256x32xf32>
    %c0_1 = arith.constant 0 : index
    %c0_2 = arith.constant 0 : index
    %12 = vector.load %arg2[%c0_1, %c0_2] : memref<32x128xf32, #tpu.memory_space<vmem>>, vector<32x128xf32>
    %cst = arith.constant dense<0.000000e+00> : vector<256x128xf32>
    %13 = tpu.matmul %11, %12, %cst {dimension_numbers = #tpu.dot_dimension_numbers<[1], [0], [0], [1], [0, 0, 1, 1], [], []>} : vector<256x32xf32>, vector<32x128xf32>, vector<256x128xf32> -> vector<256x128xf32>
    %c0_3 = arith.constant 0 : index
    %c0_4 = arith.constant 0 : index
    %14 = vector.load %arg3[%c0_3, %c0_4] : memref<256x128xf32, #tpu.memory_space<vmem>>, vector<256x128xf32>
    tpu.vector_store %arg3[%c0_3, %c0_4], %13 {strides = array<i32>} : memref<256x128xf32, #tpu.memory_space<vmem>>, vector<256x128xf32>,
    return
  }
  func.func @transform_0(%arg0: i32) -> (i32, i32) {
    %c0_i32 = arith.constant 0 : i32
    %c0_i32_0 = arith.constant 0 : i32
    return %arg0, %c0_i32 : i32, i32
  }
  func.func @transform_1(%arg0: i32) -> (i32, i32) {
    %c0_i32 = arith.constant 0 : i32
    %c0_i32_0 = arith.constant 0 : i32
    %c0_i32_1 = arith.constant 0 : i32
    return %c0_i32, %c0_i32_0 : i32, i32
  }
  func.func @transform_2(%arg0: i32) -> (i32, i32) {
    %c0_i32 = arith.constant 0 : i32
    %c0_i32_0 = arith.constant 0 : i32
    return %arg0, %c0_i32 : i32, i32
  }
}

</mosaic_0001>

<bundles_post_ra>
// kernel: tpu_custom_call.1
= control target key start
LH: loop header
LB: loop body
LE: loop exit
PB: predicated region body
PF: predicated region fallthrough
CT: control target
= control target key end

     0   :  { %7 = vsyncpa [#allocation3], 0  ;;  %s985_s0 = inlined_call_operand.hbm [shape: s32[1,256], index: 0, kind: input, shape index: {}]   ;;  %s986_s1 = inlined_call_operand.hbm [shape: f32[32,128], index: 1, kind: input, shape index: {}]   ;;  %s987_s2 = inlined_call_operand.hbm [shape: f32[256,128], index: 2, kind: output, shape index: {}]  }
   0x1   :  { %8 = vsyncpa [#allocation6], 0 }
   0x2   :  { %9 = vsyncpa [#allocation4], 0  ;;  %s15_s11 = sshll.u32 %s985_s0, 4  ;;  %s794_s12 = smov [#allocation2]   ;;  %s16_s11 = int_to_ptr.hbm [resolvable:$true] %s15_s11 }
   0x3   :  { %s17_s13 = sshll.u32 %s794_s12, 4  ;;  %s25_s16 = sshll.u32 %s986_s1, 4  ;;  %s18_s13 = int_to_ptr.vmem [resolvable:$true] %s17_s13  ;;  %s26_s16 = int_to_ptr.hbm [resolvable:$true] %s25_s16 }
   0x4   :  { %20 = dma.hbm_to_vmem [thread:$0]  %s16_s11, 32, %s18_s13, [#allocation3]  }
   0x5   :  { %s795_s17 = smov [#allocation5]   ;;  %s796_s19 = smov 128  }
   0x6   :  { %s27_s18 = sshll.u32 %s795_s17, 4  ;;  %s797_s20 = smov 8   ;;  %s28_s18 = int_to_ptr.vmem [resolvable:$true] %s27_s18 }
   0x7   :  { %33 = dma.hbm_to_vmem [thread:$0]  %s26_s16, 512, %s28_s18, [#allocation6], %s796_s19, %s796_s19, %s797_s20  }
   0x8   :  { %788 = dma.done.wait [#allocation3], 32  }
   0x9   :  { %789 = vsyncadd [#allocation3], 4294967264 }
   0xa   :  { %790 = dma.done.wait [#allocation6], 512  }
   0xb   :  { %791 = vsyncadd [#allocation6], 4294966784  ;;  %v47_v0 = vlaneseq  ;;  %v42_v3 = vld [vmem:[#allocation2] sm:$0x3]  ;;  %v343_v18 = vld [vmem:[#allocation5 + $0x10] sm:$0xff]  ;;  %vm345_vm2 = vcmask 261120  }
   0xc   :  { %vm43_vm0 = vcmp.gt.s32.totalorder %v42_v3, 0  ;;  %v344_v17 = vld [vmem:[#allocation5 + $0x18] sm:$0xff]  ;;  %v342_v21 = vld [vmem:[#allocation5 + $0x8] sm:$0xff]  ;;  %v341_v22 = vld [vmem:[#allocation5] sm:$0xff]  ;;  %v798_v28 = vmov 0.0   ;;  %s799_s0 = smov [#allocation7]  }
   0xd   :  { %v825_v1 = vshrl.u32 %v47_v0, 7  ;;  %v44_v4 = vsel %vm43_vm0, %v42_v3, 0  ;;  %454 = vmatpush.msra.mxu0 %v344_v17  ;;  %672 = vmatpush.msra.mxu2 %v344_v17  ;;  %v867_v24 = vand.u32 127, %v47_v0  ;;  %s591_s1 = sshll.u32 %s799_s0, 4  ;;  %s593_s23 = sshll.u32 %s987_s2, 4  ;;  %s592_s1 = int_to_ptr.vmem [resolvable:$true] %s591_s1  ;;  %s594_s23 = int_to_ptr.hbm [resolvable:$true] %s593_s23 }
   0xe   :  { %vm45_vm1 = vcmp.lt.s32.totalorder %v44_v4, 31  ;;  %671 = vmatpush.msra.mxu1 %v344_v17  ;;  %673 = vmatpush.msra.mxu3 %v344_v17 }
   0xf   :  { %691 = vset.pattern.permute.xlu1 %v825_v1  ;;  %689 = vset.pattern.permute.xlu0 %v825_v1  ;;  %v60_v2 = vadd.s32 8, %v825_v1  ;;  %v46_v5 = vsel %vm45_vm1, %v44_v4, 31  ;;  %v102_v10 = vadd.s32 64, %v825_v1  ;;  %v108_v11 = vadd.s32 72, %v825_v1 }
  0x10   :  { %v49_v6 = vperm.slane %v46_v5, 0  ;;  %v50_v7 = vperm.slane %v46_v5, 1  ;;  %v66_v12 = vadd.s32 16, %v825_v1  ;;  %v114_v13 = vadd.s32 80, %v825_v1  ;;  %455 = vmatpush.msra.mxu0 %v343_v18  ;;  %675 = vmatpush.msra.mxu2 %v343_v18 }
  0x11   :  { %693 = vset.pattern.permute.xlu2 %v60_v2  ;;  %v72_v14 = vadd.s32 24, %v825_v1  ;;  %v120_v15 = vadd.s32 88, %v825_v1  ;;  %v78_v16 = vadd.s32 32, %v825_v1  ;;  %674 = vmatpush.msra.mxu1 %v343_v18  ;;  %v126_v19 = vadd.s32 96, %v825_v1 }
  0x12   :  { %v830_v8 = vperm.slane %v49_v6, 0  ;;  %v832_v9 = vperm.slane %v50_v7, 0  ;;  %676 = vmatpush.msra.mxu3 %v343_v18  ;;  %v132_v20 = vadd.s32 104, %v825_v1  ;;  %456 = vmatpush.msra.mxu0 %v342_v21  ;;  %v84_v23 = vadd.s32 40, %v825_v1 }
  0x13   :  { %678 = vmatpush.msra.mxu2 %v342_v21  ;;  %677 = vmatpush.msra.mxu1 %v342_v21  ;;  %v138_v31 = vadd.s32 112, %v825_v1  ;;  %v96_v32 = vadd.s32 56, %v825_v1  ;;  %v90_v35 = vadd.s32 48, %v825_v1  ;;  %v144_v41 = vadd.s32 120, %v825_v1 }
  0x14   :  { %679 = vmatpush.msra.mxu3 %v342_v21  ;;  %457 = vmatpush.msra.mxu0 %v341_v22 }
  0x15   :  { %681 = vmatpush.msra.mxu2 %v341_v22  ;;  %680 = vmatpush.msra.mxu1 %v341_v22 }
  0x16   :  { %682 = vmatpush.msra.mxu3 %v341_v22 }
  0x17   :  { %56 = vperm.xlu1 %691, %v830_v8   ;;  %153 = vperm.xlu0 %689, %v832_v9  }
  0x19   :  { %159 = vperm.xlu2 %693, %v832_v9  }
  0x1f   :  { %692 = vset.pattern.permute.xlu1 %v102_v10  ;;  %690 = vset.pattern.permute.xlu0 %v102_v10 }
  0x21   :  { %694 = vset.pattern.permute.xlu2 %v108_v11 }
  0x27   :  { %104 = vperm.xlu1 %692, %v830_v8   ;;  %201 = vperm.xlu0 %690, %v832_v9  }
  0x29   :  { %207 = vperm.xlu2 %694, %v832_v9  }
  0x2f   :  { %695 = vset.pattern.permute.xlu1 %v60_v2  ;;  %696 = vset.pattern.permute.xlu0 %v66_v12 }
  0x31   :  { %110 = vperm.xlu2 %694, %v830_v8  }
  0x37   :  { %62 = vperm.xlu1 %695, %v830_v8   ;;  %165 = vperm.xlu0 %696, %v832_v9  }
  0x39   :  { %698 = vset.pattern.permute.xlu2 %v66_v12 }
  0x3f   :  { %697 = vset.pattern.permute.xlu1 %v114_v13  ;;  %700 = vset.pattern.permute.xlu0 %v120_v15 }
  0x41   :  { %68 = vperm.xlu2 %698, %v830_v8  }
  0x47   :  { %213 = vperm.xlu1 %697, %v832_v9   ;;  %219 = vperm.xlu0 %700, %v832_v9  }
  0x49   :  { %699 = vset.pattern.permute.xlu2 %v72_v14 }
  0x4f   :  { %116 = vperm.xlu1 %697, %v830_v8   ;;  %705 = vset.pattern.permute.xlu0 %v78_v16 }
  0x51   :  { %171 = vperm.xlu2 %699, %v832_v9  }
  0x57   :  { %701 = vset.pattern.permute.xlu1 %v72_v14  ;;  %80 = vperm.xlu0 %705, %v830_v8  }
  0x59   :  { %702 = vset.pattern.permute.xlu2 %v120_v15 }
  0x5f   :  { %74 = vperm.xlu1 %701, %v830_v8   ;;  %709 = vset.pattern.permute.xlu0 %v132_v20 }
  0x61   :  { %122 = vperm.xlu2 %702, %v830_v8  }
  0x67   :  { %703 = vset.pattern.permute.xlu1 %v78_v16  ;;  %134 = vperm.xlu0 %709, %v830_v8  }
  0x69   :  { %704 = vset.pattern.permute.xlu2 %v126_v19 }
  0x6f   :  { %177 = vperm.xlu1 %703, %v832_v9   ;;  %712 = vset.pattern.permute.xlu0 %v96_v32 }
  0x71   :  { %225 = vperm.xlu2 %704, %v832_v9  }
  0x73   :  { %v160_v25 = vpop.permute.xlu2 %159 }
  0x74   :  { %vm262_vm5 = vcmp.eq.s32.totalorder %v160_v25, %v867_v24 }
  0x75   :  { %v624_v33 = vsel %vm262_vm5, 1.0, %v798_v28 }
  0x77   :  { %706 = vset.pattern.permute.xlu1 %v126_v19  ;;  %195 = vperm.xlu0 %712, %v832_v9  }
  0x79   :  { %707 = vset.pattern.permute.xlu2 %v84_v23 }
  0x7f   :  { %128 = vperm.xlu1 %706, %v830_v8   ;;  %715 = vset.pattern.permute.xlu0 %v144_v41 }
  0x81   :  { %183 = vperm.xlu2 %707, %v832_v9  }
  0x83   :  { %v208_v34 = vpop.permute.xlu2 %207 }
  0x84   :  { %vm270_vm8 = vcmp.eq.s32.totalorder %v208_v34, %v867_v24 }
  0x85   :  { %v632_v42 = vsel %vm270_vm8, 1.0, %v798_v28 }
  0x87   :  { %708 = vset.pattern.permute.xlu1 %v132_v20 }
  0x89   :  { %86 = vperm.xlu2 %707, %v830_v8   ;;  %v57_v26 = vpop.permute.xlu1 %56  ;;  %v154_v27 = vpop.permute.xlu0 %153 }
  0x8a   :  { %vm245_vm3 = vcmp.eq.s32.totalorder %v57_v26, %v867_v24  ;;  %vm261_vm4 = vcmp.eq.s32.totalorder %v154_v27, %v867_v24 }
  0x8b   :  { %v607_v29 = vsel %vm245_vm3, 1.0, %v798_v28  ;;  %v623_v30 = vsel %vm261_vm4, 1.0, %v798_v28  ;;  %v111_v40 = vpop.permute.xlu2 %110 }
  0x8c   :  { %639 = vmatmul.msk.f32.vlgmr.msra.gmra.mxu0 %vm345_vm2, %v607_v29  ;;  %655 = vmatmul.msk.f32.vlgmr.msra.gmra.mxu2 %vm345_vm2, %v623_v30  ;;  %vm254_vm9 = vcmp.eq.s32.totalorder %v111_v40, %v867_v24 }
  0x8d   :  { %v616_v43 = vsel %vm254_vm9, 1.0, %v798_v28 }
  0x8f   :  { %231 = vperm.xlu1 %708, %v832_v9  }
  0x91   :  { %711 = vset.pattern.permute.xlu2 %v138_v31 }
  0x94   :  { %656 = vmatmul.msk.f32.gmra.mxu2 %vm345_vm2, %v624_v33 }
  0x97   :  { %710 = vset.pattern.permute.xlu1 %v90_v35 }
  0x99   :  { %237 = vperm.xlu2 %711, %v832_v9   ;;  %v105_v36 = vpop.permute.xlu1 %104  ;;  %v202_v37 = vpop.permute.xlu0 %201 }
  0x9a   :  { %vm253_vm6 = vcmp.eq.s32.totalorder %v105_v36, %v867_v24  ;;  %vm269_vm7 = vcmp.eq.s32.totalorder %v202_v37, %v867_v24 }
  0x9b   :  { %v615_v38 = vsel %vm253_vm6, 1.0, %v798_v28  ;;  %v631_v39 = vsel %vm269_vm7, 1.0, %v798_v28  ;;  %v69_v44 = vpop.permute.xlu2 %68 }
  0x9c   :  { %647 = vmatmul.msk.f32.vlgmr.msra.gmra.mxu1 %vm345_vm2, %v615_v38  ;;  %663 = vmatmul.msk.f32.vlgmr.msra.gmra.mxu3 %vm345_vm2, %v631_v39  ;;  %vm247_vm12 = vcmp.eq.s32.totalorder %v69_v44, %v867_v24 }
  0x9d   :  { %v609_v50 = vsel %vm247_vm12, 1.0, %v798_v28 }
  0x9f   :  { %189 = vperm.xlu1 %710, %v832_v9  }
  0xa1   :  { %140 = vperm.xlu2 %711, %v830_v8  }
  0xa4   :  { %648 = vmatmul.msk.f32.gmra.mxu1 %vm345_vm2, %v616_v43  ;;  %664 = vmatmul.msk.f32.gmra.mxu3 %vm345_vm2, %v632_v42 }
  0xa7   :  { %92 = vperm.xlu1 %710, %v830_v8  }
  0xa9   :  { %714 = vset.pattern.permute.xlu2 %v96_v32  ;;  %v63_v45 = vpop.permute.xlu1 %62  ;;  %v166_v46 = vpop.permute.xlu0 %165 }
  0xaa   :  { %vm246_vm10 = vcmp.eq.s32.totalorder %v63_v45, %v867_v24  ;;  %vm263_vm11 = vcmp.eq.s32.totalorder %v166_v46, %v867_v24 }
  0xab   :  { %v608_v47 = vsel %vm246_vm10, 1.0, %v798_v28  ;;  %v625_v48 = vsel %vm263_vm11, 1.0, %v798_v28  ;;  %v172_v49 = vpop.permute.xlu2 %171 }
  0xac   :  { %640 = vmatmul.msk.f32.gmra.mxu0 %vm345_vm2, %v608_v47  ;;  %657 = vmatmul.msk.f32.gmra.mxu2 %vm345_vm2, %v625_v48  ;;  %vm264_vm13 = vcmp.eq.s32.totalorder %v172_v49, %v867_v24 }
  0xad   :  { %v626_v51 = vsel %vm264_vm13, 1.0, %v798_v28 }
  0xaf   :  { %713 = vset.pattern.permute.xlu1 %v144_v41 }
  0xb1   :  { %98 = vperm.xlu2 %714, %v830_v8  }
  0xb4   :  { %641 = vmatmul.msk.f32.gmra.mxu0 %vm345_vm2, %v609_v50  ;;  %658 = vmatmul.msk.f32.gmra.mxu2 %vm345_vm2, %v626_v51 }
  0xb7   :  { %243 = vperm.xlu1 %713, %v832_v9  }
  0xb9   :  { %v214_v52 = vpop.permute.xlu1 %213  ;;  %v220_v57 = vpop.permute.xlu0 %219 }
  0xba   :  { %vm271_vm14 = vcmp.eq.s32.totalorder %v214_v52, %v867_v24  ;;  %vm272_vm0 = vcmp.eq.s32.totalorder %v220_v57, %v867_v24 }
  0xbb   :  { %v633_v53 = vsel %vm271_vm14, 1.0, %v798_v28  ;;  %v123_v55 = vpop.permute.xlu2 %122  ;;  %v634_v58 = vsel %vm272_vm0, 1.0, %v798_v28 }
  0xbc   :  { %665 = vmatmul.msk.f32.gmra.mxu3 %vm345_vm2, %v633_v53  ;;  %vm256_vm1 = vcmp.eq.s32.totalorder %v123_v55, %v867_v24 }
  0xbd   :  { %v618_v59 = vsel %vm256_vm1, 1.0, %v798_v28 }
  0xbf   :  { %146 = vperm.xlu1 %713, %v830_v8  }
  0xc1   :  { %v117_v54 = vpop.permute.xlu1 %116 }
  0xc2   :  { %vm255_vm15 = vcmp.eq.s32.totalorder %v117_v54, %v867_v24 }
  0xc3   :  { %v617_v56 = vsel %vm255_vm15, 1.0, %v798_v28 }
  0xc4   :  { %649 = vmatmul.msk.f32.gmra.mxu1 %vm345_vm2, %v617_v56  ;;  %666 = vmatmul.msk.f32.gmra.mxu3 %vm345_vm2, %v634_v58 }
  0xc9   :  { %v81_v0 = vpop.permute.xlu0 %80 }
  0xca   :  { %vm249_vm5 = vcmp.eq.s32.totalorder %v81_v0, %v867_v24 }
  0xcb   :  { %v226_v60 = vpop.permute.xlu2 %225  ;;  %v611_v1 = vsel %vm249_vm5, 1.0, %v798_v28 }
  0xcc   :  { %vm273_vm3 = vcmp.eq.s32.totalorder %v226_v60, %v867_v24  ;;  %650 = vmatmul.msk.f32.gmra.mxu1 %vm345_vm2, %v618_v59 }
  0xcd   :  { %v635_v61 = vsel %vm273_vm3, 1.0, %v798_v28 }
  0xce   :  { %667 = vmatmul.msk.f32.gmra.mxu3 %vm345_vm2, %v635_v61 }
  0xd1   :  { %v75_v62 = vpop.permute.xlu1 %74 }
  0xd2   :  { %vm248_vm4 = vcmp.eq.s32.totalorder %v75_v62, %v867_v24 }
  0xd3   :  { %v610_v63 = vsel %vm248_vm4, 1.0, %v798_v28 }
  0xd4   :  { %642 = vmatmul.msk.f32.gmra.mxu0 %vm345_vm2, %v610_v63 }
  0xd9   :  { %v135_v11 = vpop.permute.xlu0 %134 }
  0xda   :  { %vm258_vm10 = vcmp.eq.s32.totalorder %v135_v11, %v867_v24 }
  0xdb   :  { %v184_v2 = vpop.permute.xlu2 %183  ;;  %v620_v12 = vsel %vm258_vm10, 1.0, %v798_v28 }
  0xdc   :  { %643 = vmatmul.msk.f32.gmra.mxu0 %vm345_vm2, %v611_v1  ;;  %vm266_vm8 = vcmp.eq.s32.totalorder %v184_v2, %v867_v24 }
  0xdd   :  { %v628_v7 = vsel %vm266_vm8, 1.0, %v798_v28 }
  0xe1   :  { %v178_v3 = vpop.permute.xlu1 %177 }
  0xe2   :  { %vm265_vm6 = vcmp.eq.s32.totalorder %v178_v3, %v867_v24 }
  0xe3   :  { %v87_v4 = vpop.permute.xlu2 %86  ;;  %v627_v5 = vsel %vm265_vm6, 1.0, %v798_v28 }
  0xe4   :  { %vm250_vm7 = vcmp.eq.s32.totalorder %v87_v4, %v867_v24  ;;  %659 = vmatmul.msk.f32.gmra.mxu2 %vm345_vm2, %v627_v5 }
  0xe5   :  { %v612_v6 = vsel %vm250_vm7, 1.0, %v798_v28 }
  0xe6   :  { %644 = vmatmul.msk.f32.gmra.mxu0 %vm345_vm2, %v612_v6 }
  0xe9   :  { %v196_v22 = vpop.permute.xlu0 %195 }
  0xea   :  { %vm268_vm15 = vcmp.eq.s32.totalorder %v196_v22, %v867_v24 }
  0xeb   :  { %v630_v27 = vsel %vm268_vm15, 1.0, %v798_v28 }
  0xec   :  { %660 = vmatmul.msk.f32.gmra.mxu2 %vm345_vm2, %v628_v7 }
  0xf1   :  { %v129_v8 = vpop.permute.xlu1 %128 }
  0xf2   :  { %vm257_vm9 = vcmp.eq.s32.totalorder %v129_v8, %v867_v24 }
  0xf3   :  { %v238_v9 = vpop.permute.xlu2 %237  ;;  %v619_v10 = vsel %vm257_vm9, 1.0, %v798_v28 }
  0xf4   :  { %651 = vmatmul.msk.f32.gmra.mxu1 %vm345_vm2, %v619_v10  ;;  %vm275_vm13 = vcmp.eq.s32.totalorder %v238_v9, %v867_v24 }
  0xf5   :  { %v637_v18 = vsel %vm275_vm13, 1.0, %v798_v28 }
  0xfb   :  { %v141_v13 = vpop.permute.xlu2 %140 }
  0xfc   :  { %652 = vmatmul.msk.f32.gmra.mxu1 %vm345_vm2, %v620_v12  ;;  %vm259_vm11 = vcmp.eq.s32.totalorder %v141_v13, %v867_v24 }
  0xfd   :  { %v621_v15 = vsel %vm259_vm11, 1.0, %v798_v28 }
 0x101   :  { %v232_v14 = vpop.permute.xlu1 %231 }
 0x102   :  { %vm274_vm12 = vcmp.eq.s32.totalorder %v232_v14, %v867_v24 }
 0x103   :  { %v636_v16 = vsel %vm274_vm12, 1.0, %v798_v28 }
 0x104   :  { %668 = vmatmul.msk.f32.gmra.mxu3 %vm345_vm2, %v636_v16  ;;  %653 = vmatmul.msk.f32.gmra.mxu1 %vm345_vm2, %v621_v15 }
 0x109   :  { %v459_v17 = vpop.f32.mrf.mxu0 }
 0x10a   :  { %555 = vst [vmem:[#allocation7] sm:$0xff] %v459_v17 }
 0x10b   :  { %v99_v30 = vpop.permute.xlu2 %98 }
 0x10c   :  { %669 = vmatmul.msk.f32.gmra.mxu3 %vm345_vm2, %v637_v18  ;;  %vm252_vm1 = vcmp.eq.s32.totalorder %v99_v30, %v867_v24 }
 0x10d   :  { %v614_v33 = vsel %vm252_vm1, 1.0, %v798_v28 }
 0x10f   :  { %v507_v19 = vpop.f32.mrf.mxu2 }
 0x110   :  { %571 = vst [vmem:[#allocation7 + $0x80] sm:$0xff] %v507_v19 }
 0x111   :  { %v190_v20 = vpop.permute.xlu1 %189 }
 0x112   :  { %vm267_vm14 = vcmp.eq.s32.totalorder %v190_v20, %v867_v24 }
 0x113   :  { %v629_v21 = vsel %vm267_vm14, 1.0, %v798_v28 }
 0x114   :  { %661 = vmatmul.msk.f32.gmra.mxu2 %vm345_vm2, %v629_v21 }
 0x117   :  { %v510_v23 = vpop.f32.mrf.mxu2 }
 0x118   :  { %572 = vst [vmem:[#allocation7 + $0x88] sm:$0xff] %v510_v23 }
 0x119   :  { %v483_v25 = vpop.f32.mrf.mxu1  ;;  %v93_v26 = vpop.permute.xlu1 %92 }
 0x11a   :  { %563 = vst [vmem:[#allocation7 + $0x40] sm:$0xff] %v483_v25  ;;  %vm251_vm0 = vcmp.eq.s32.totalorder %v93_v26, %v867_v24 }
 0x11b   :  { %v613_v29 = vsel %vm251_vm0, 1.0, %v798_v28 }
 0x11c   :  { %645 = vmatmul.msk.f32.gmra.mxu0 %vm345_vm2, %v613_v29  ;;  %662 = vmatmul.msk.f32.gmra.mxu2 %vm345_vm2, %v630_v27 }
 0x11f   :  { %v531_v31 = vpop.f32.mrf.mxu3 }
 0x120   :  { %579 = vst [vmem:[#allocation7 + $0xc0] sm:$0xff] %v531_v31 }
 0x121   :  { %v486_v32 = vpop.f32.mrf.mxu1 }
 0x122   :  { %564 = vst [vmem:[#allocation7 + $0x48] sm:$0xff] %v486_v32 }
 0x124   :  { %646 = vmatmul.msk.f32.gmra.mxu0 %vm345_vm2, %v614_v33 }
 0x127   :  { %v534_v34 = vpop.f32.mrf.mxu3 }
 0x128   :  { %580 = vst [vmem:[#allocation7 + $0xc8] sm:$0xff] %v534_v34 }
 0x129   :  { %v462_v35 = vpop.f32.mrf.mxu0  ;;  %v244_v36 = vpop.permute.xlu1 %243 }
 0x12a   :  { %556 = vst [vmem:[#allocation7 + $0x8] sm:$0xff] %v462_v35  ;;  %vm276_vm3 = vcmp.eq.s32.totalorder %v244_v36, %v867_v24 }
 0x12b   :  { %v638_v37 = vsel %vm276_vm3, 1.0, %v798_v28 }
 0x12c   :  { %670 = vmatmul.msk.f32.gmra.mxu3 %vm345_vm2, %v638_v37 }
 0x12f   :  { %v513_v38 = vpop.f32.mrf.mxu2 }
 0x130   :  { %573 = vst [vmem:[#allocation7 + $0x90] sm:$0xff] %v513_v38 }
 0x131   :  { %v147_v39 = vpop.permute.xlu1 %146  ;;  %v465_v40 = vpop.f32.mrf.mxu0 }
 0x132   :  { %vm260_vm4 = vcmp.eq.s32.totalorder %v147_v39, %v867_v24  ;;  %557 = vst [vmem:[#allocation7 + $0x10] sm:$0xff] %v465_v40 }
 0x133   :  { %v622_v41 = vsel %vm260_vm4, 1.0, %v798_v28 }
 0x134   :  { %654 = vmatmul.msk.f32.gmra.mxu1 %vm345_vm2, %v622_v41 }
 0x137   :  { %v516_v42 = vpop.f32.mrf.mxu2 }
 0x138   :  { %574 = vst [vmem:[#allocation7 + $0x98] sm:$0xff] %v516_v42 }
 0x13f   :  { %v537_v43 = vpop.f32.mrf.mxu3 }
 0x140   :  { %581 = vst [vmem:[#allocation7 + $0xd0] sm:$0xff] %v537_v43 }
 0x141   :  { %v489_v44 = vpop.f32.mrf.mxu1 }
 0x142   :  { %565 = vst [vmem:[#allocation7 + $0x50] sm:$0xff] %v489_v44 }
 0x147   :  { %v540_v46 = vpop.f32.mrf.mxu3 }
 0x148   :  { %582 = vst [vmem:[#allocation7 + $0xd8] sm:$0xff] %v540_v46 }
 0x149   :  { %v492_v45 = vpop.f32.mrf.mxu1 }
 0x14a   :  { %566 = vst [vmem:[#allocation7 + $0x58] sm:$0xff] %v492_v45 }
 0x151   :  { %v468_v47 = vpop.f32.mrf.mxu0  ;;  %v543_v48 = vpop.f32.mrf.mxu3 }
 0x152   :  { %558 = vst [vmem:[#allocation7 + $0x18] sm:$0xff] %v468_v47 }
 0x153   :  { %583 = vst [vmem:[#allocation7 + $0xe0] sm:$0xff] %v543_v48 }
 0x159   :  { %v471_v24 = vpop.f32.mrf.mxu0 }
 0x15a   :  { %559 = vst [vmem:[#allocation7 + $0x20] sm:$0xff] %v471_v24 }
 0x163   :  { %v474_v49 = vpop.f32.mrf.mxu0 }
 0x164   :  { %560 = vst [vmem:[#allocation7 + $0x28] sm:$0xff] %v474_v49 }
 0x167   :  { %v519_v28 = vpop.f32.mrf.mxu2 }
 0x168   :  { %575 = vst [vmem:[#allocation7 + $0xa0] sm:$0xff] %v519_v28 }
 0x16f   :  { %v522_v50 = vpop.f32.mrf.mxu2 }
 0x170   :  { %576 = vst [vmem:[#allocation7 + $0xa8] sm:$0xff] %v522_v50 }
 0x171   :  { %v495_v51 = vpop.f32.mrf.mxu1 }
 0x172   :  { %567 = vst [vmem:[#allocation7 + $0x60] sm:$0xff] %v495_v51 }
 0x179   :  { %v498_v52 = vpop.f32.mrf.mxu1 }
 0x17a   :  { %568 = vst [vmem:[#allocation7 + $0x68] sm:$0xff] %v498_v52 }
 0x181   :  { %v501_v53 = vpop.f32.mrf.mxu1 }
 0x182   :  { %569 = vst [vmem:[#allocation7 + $0x70] sm:$0xff] %v501_v53 }
 0x187   :  { %v546_v54 = vpop.f32.mrf.mxu3 }
 0x188   :  { %584 = vst [vmem:[#allocation7 + $0xe8] sm:$0xff] %v546_v54 }
 0x18f   :  { %v549_v55 = vpop.f32.mrf.mxu3 }
 0x190   :  { %585 = vst [vmem:[#allocation7 + $0xf0] sm:$0xff] %v549_v55 }
 0x197   :  { %v525_v56 = vpop.f32.mrf.mxu2 }
 0x198   :  { %577 = vst [vmem:[#allocation7 + $0xb0] sm:$0xff] %v525_v56 }
 0x199   :  { %v477_v57 = vpop.f32.mrf.mxu0 }
 0x19a   :  { %561 = vst [vmem:[#allocation7 + $0x30] sm:$0xff] %v477_v57 }
 0x19f   :  { %v528_v58 = vpop.f32.mrf.mxu2 }
 0x1a0   :  { %578 = vst [vmem:[#allocation7 + $0xb8] sm:$0xff] %v528_v58 }
 0x1a1   :  { %v480_v59 = vpop.f32.mrf.mxu0 }
 0x1a2   :  { %562 = vst [vmem:[#allocation7 + $0x38] sm:$0xff] %v480_v59 }
 0x1af   :  { %v552_v60 = vpop.f32.mrf.mxu3 }
 0x1b0   :  { %586 = vst [vmem:[#allocation7 + $0xf8] sm:$0xff] %v552_v60 }
 0x1b1   :  { %v504_v61 = vpop.f32.mrf.mxu1 }
 0x1b2   :  { %570 = vst [vmem:[#allocation7 + $0x78] sm:$0xff] %v504_v61 }
 0x1b3   :  { %599 = dma.vmem_to_hbm [thread:$0]  %s592_s1, 4096, %s594_s23, [#allocation4], %s796_s19, %s796_s19, %s797_s20  }
 0x1b4   :  { %792 = dma.done.wait [#allocation4], 4096  }
 0x1b5   :  { %793 = vsyncadd [#allocation4], 4294963200 }
 0x1b6   :  { %604 = vsyncpa [#allocation3], 1 }
 0x1b7   :  { %605 = vsyncpa [#allocation6], 1 }
 0x1b8   :  { %606 = vsyncpa [#allocation4], 1 }

</bundles_post_ra>
